<compile_context>
chip_gen: v7x
topology: tpu7x:2x2x1
jax: 0.10.0
libtpu: 0.0.40
codegen_flags: <defaults>
</compile_context>

<pallas_src>
import functools

import jax
import jax.numpy as jnp
from jax.experimental import pallas as pl
from jax.experimental.pallas import tpu as pltpu


def _round_up(v, m):
    return (v + m - 1) // m * m


def _vmem_capacity_bytes():
    """Trace-time VMEM capacity query; conservative (v7x) fallback."""
    try:
        return int(pltpu.get_tpu_info().vmem_capacity_bytes)
    except Exception:
        return 64 * 1024 * 1024   # v7x has 64 MiB; v5e/v6e have 128 MiB


def pad_params(w, b):
    """Pad the class axis of (W, b) to a lane-dense multiple of 128.

    Pad columns carry a -1e30 bias so they vanish from the softmax
    normalizer.  W is stored bf16 (MXU-native, halves its VMEM footprint);
    the bias stays f32.  Call ONCE at parameter-init time (hoisted out of the
    per-call path).
    """
    D, C = w.shape
    Cp = _round_up(max(C, 1), 128)
    w_p = jnp.zeros((D, Cp), jnp.bfloat16).at[:, :C].set(w.astype(jnp.bfloat16))
    b_p = jnp.full((1, Cp), -1e30, jnp.float32).at[:, :C].set(
        jnp.asarray(b, jnp.float32).reshape(1, C))
    return w_p, b_p


# ----------------------------------------------------------------------------
# Fused kernel: linear -> log_softmax -> per-block NLL partial, one batch tile
# per grid step.  No cross-iteration carry => the grid axis is 'parallel'.
# ----------------------------------------------------------------------------
def _make_fused_kernel(n_rows, emit_logp):
    def kernel(x_ref, w_ref, b_ref, y_ref, *out_refs):
        if emit_logp:
            logp_ref, part_ref = out_refs
        else:
            (part_ref,) = out_refs

        i = pl.program_id(0)

        # ----- classifier head: bf16 operands on the MXU, f32 accumulation --
        logits = jnp.dot(x_ref[...], w_ref[...],
                         preferred_element_type=jnp.float32)
        logits = logits + b_ref[...]        # (1, Cp) f32 bias; pad cols = -1e30

        # ----- numerically-stable log_softmax over the (padded) class axis --
        m = jnp.max(logits, axis=-1, keepdims=True)
        z = logits - m
        lse = jnp.log(jnp.sum(jnp.exp(z), axis=-1, keepdims=True))
        logp = z - lse                                       # (TB, Cp) f32

        if emit_logp:
            logp_ref[...] = logp.astype(logp_ref.dtype)      # lane-dense store

        # ----- per-block NLL partial ----------------------------------------
        tb, cp = logp.shape
        class_ids = jax.lax.broadcasted_iota(jnp.int32, (tb, cp), 1)
        onehot = class_ids == y_ref[...]                     # (TB, 1) broadcast
        picked = jnp.sum(jnp.where(onehot, logp, 0.0), axis=-1,
                         keepdims=True)                      # (TB, 1)
        # mask rows past the true batch size (ragged last block)
        row_ids = i * tb + jax.lax.broadcasted_iota(jnp.int32, (tb, 1), 0)
        picked = jnp.where(row_ids < n_rows, picked, 0.0)
        tile_nll = -jnp.sum(picked, axis=0, keepdims=True)   # (1, 1)
        # broadcast across the lane dim: one unmasked (1, 128) store per step
        part_ref[...] = jnp.broadcast_to(tile_nll, part_ref.shape).astype(
            part_ref.dtype)

    return kernel


# ----------------------------------------------------------------------------
# Wrapper: VMEM-budgeted batch tiling, bf16 input stream, parallel grid axis.
# ----------------------------------------------------------------------------
@functools.partial(jax.jit, static_argnames=("emit_logp", "block_b"))
def fused_forward_nll(x, w_p, b_p, y, *, emit_logp=True, block_b=None):
    """Fused log_softmax(x @ W + b) and nll_loss(mean).

    Expects pre-padded parameters from pad_params (W bf16 (D, Cp), b f32
    (1, Cp) with -1e30 pad columns).  Returns (padded_log_probs | None, loss).
    """
    B, D = x.shape
    Dw, Cp = w_p.shape
    assert Dw == D and Cp % 128 == 0, "use pad_params() to prepare W/b"

    x = x.astype(jnp.bfloat16)          # halve the dominant HBM input stream
    y_col = y.reshape(B, 1).astype(jnp.int32)

    # ---- VMEM budgeting: pick the largest batch tile that fits -------------
    cap = _vmem_capacity_bytes()
    tile_budget = int(cap * 0.6)        # leave headroom for compiler scratch
    resident = 2 * Dw * Cp * 2 + 2 * Cp * 4          # W (bf16) + b (f32), 2 bufs
    per_row = 2 * D * 2 + 2 * 128 * 4                # x (bf16) + y (lane-padded)
    if emit_logp:
        per_row += 2 * Cp * 4                        # (TB, Cp) f32 writeback
    tb_cap = max(8, (tile_budget - resident) // max(per_row, 1))
    tb_cap = min(tb_cap, 1024 if block_b is None else block_b)
    tb_cap = max(8, (tb_cap // 8) * 8)               # sublane-aligned tile
    TB = B if B <= tb_cap else tb_cap
    grid_b = pl.cdiv(B, TB)

    in_specs = [
        pl.BlockSpec((TB, D), lambda i: (i, 0)),     # x : streamed over batch
        pl.BlockSpec((Dw, Cp), lambda i: (0, 0)),    # W : VMEM-resident
        pl.BlockSpec((1, Cp), lambda i: (0, 0)),     # b : VMEM-resident
        pl.BlockSpec((TB, 1), lambda i: (i, 0)),     # y : streamed over batch
    ]
    part_shape = jax.ShapeDtypeStruct((1, grid_b * 128), jnp.float32)
    part_spec = pl.BlockSpec((1, 128), lambda i: (0, i))
    if emit_logp:
        out_shape = (jax.ShapeDtypeStruct((B, Cp), jnp.float32), part_shape)
        out_specs = (pl.BlockSpec((TB, Cp), lambda i: (i, 0)), part_spec)
    else:
        out_shape = part_shape
        out_specs = part_spec

    outs = pl.pallas_call(
        _make_fused_kernel(B, emit_logp),
        out_shape=out_shape,
        grid=(grid_b,),
        in_specs=in_specs,
        out_specs=out_specs,
        compiler_params=pltpu.CompilerParams(
            dimension_semantics=("parallel",),   # per-block partials -> megacore
            vmem_limit_bytes=int(cap * 0.75),    # ~48 MiB v7x, ~96 MiB v5e/v6e
        ),
    )(x, w_p, b_p, y_col)

    if emit_logp:
        logp_p, parts = outs
    else:
        logp_p, parts = None, outs

    # tiny wrapper-side reduce of the per-block partials (lane 0 of each block)
    loss = jnp.sum(parts[0, ::128]) * (1.0 / B)
    return logp_p, loss


# ----------------------------------------------------------------------------
# Thin JAX-side "Network" wrapper (parameters + forward), mirroring the
# torch.nn.Module structure.  learning_rate kept only as metadata.
# ----------------------------------------------------------------------------
class PallasNetwork:
    def __init__(self, learning_rate, in_features, num_classes, key):
        self.learning_rate = learning_rate
        self.num_classes = num_classes
        kw, kb = jax.random.split(key)
        self.w = (jax.random.normal(kw, (in_features, num_classes), jnp.float32)
                  * 0.02)
        self.b = jax.random.normal(kb, (num_classes,), jnp.float32) * 0.01
        # padding + bf16 cast hoisted out of the per-call path (done once here)
        self.w_p, self.b_p = pad_params(self.w, self.b)

    def forward(self, x):
        # NLL partials against dummy labels are computed but discarded
        # (negligible; do not read them).
        logp_p, _ = fused_forward_nll(
            x, self.w_p, self.b_p, jnp.zeros((x.shape[0],), jnp.int32),
            emit_logp=True)
        return logp_p[:, :self.num_classes]

    def forward_with_loss(self, x, y):
        # returns the PADDED (B, Cp) log-probs; slice lazily at the consumer.
        return fused_forward_nll(x, self.w_p, self.b_p, y, emit_logp=True)

    def loss_only(self, x, y):
        # training-step path: drops the log-prob writeback entirely.
        _, loss = fused_forward_nll(x, self.w_p, self.b_p, y, emit_logp=False)
        return loss

    def getLearningRate(self):
        return self.learning_rate


if __name__ == "__main__":
    B, D, C = 8, 32, 16

    key = jax.random.PRNGKey(0)
    kx, ky, kp = jax.random.split(key, 3)
    x = jax.random.normal(kx, (B, D), jnp.float32)
    y = jax.random.randint(ky, (B,), 0, C, jnp.int32)

    net = PallasNetwork(learning_rate=1e-3, in_features=D, num_classes=C, key=kp)

    logp_padded, loss = net.forward_with_loss(x, y)
    loss_fast = net.loss_only(x, y)
    jax.block_until_ready((logp_padded, loss, loss_fast))

    log_probs = logp_padded[:, :C]

    # correctness sanity check against a plain-JAX reference that applies the
    # same bf16 rounding to the streamed operands (all remaining math is f32)
    xr = x.astype(jnp.bfloat16).astype(jnp.float32)
    wr = net.w.astype(jnp.bfloat16).astype(jnp.float32)
    ref_logits = xr @ wr + net.b.reshape(1, C)
    ref_logp = jax.nn.log_softmax(ref_logits, axis=-1)
    ref_loss = -jnp.mean(ref_logp[jnp.arange(B), y])

    assert jnp.allclose(log_probs, ref_logp, atol=2e-3), "log_softmax mismatch"
    assert jnp.allclose(loss, ref_loss, atol=2e-3), "nll_loss mismatch"
    assert jnp.allclose(loss_fast, ref_loss, atol=2e-3), "loss_only mismatch"

    print("KERNEL_OK")
</pallas_src>

<mosaic_0001>
module attributes {stable_mosaic.version = 11 : i64} {
  func.func @kernel(%arg0: i32, %arg1: memref<8x32xbf16, #tpu.memory_space<vmem>>, %arg2: memref<32x128xbf16, #tpu.memory_space<vmem>>, %arg3: memref<1x128xf32, #tpu.memory_space<vmem>>, %arg4: memref<8x1xi32, #tpu.memory_space<vmem>>, %arg5: memref<8x128xf32, #tpu.memory_space<vmem>>, %arg6: memref<1x128xf32, #tpu.memory_space<vmem>>) attributes {dimension_semantics = [#tpu.dimension_semantics<parallel>], iteration_bounds = array<i64: 1>, scalar_prefetch = 0 : i64, scratch_operands = 0 : i64, tpu.core_type = #tpu.core_type<tc>, window_params = [{transform_indices = @transform_0, window_bounds = array<i64: 8, 32>}, {pipeline_mode = #tpu.pipeline_mode<synchronous>, transform_indices = @transform_1, window_bounds = array<i64: 32, 128>}, {pipeline_mode = #tpu.pipeline_mode<synchronous>, transform_indices = @transform_2, window_bounds = array<i64: 1, 128>}, {transform_indices = @transform_3, window_bounds = array<i64: 8, 1>}, {transform_indices = @transform_4, window_bounds = array<i64: 8, 128>}, {transform_indices = @transform_5, window_bounds = array<i64: 1, 128>}]} {
    %c0 = arith.constant 0 : index
    %c0_0 = arith.constant 0 : index
    %0 = vector.load %arg1[%c0, %c0_0] : memref<8x32xbf16, #tpu.memory_space<vmem>>, vector<8x32xbf16>
    %c0_1 = arith.constant 0 : index
    %c0_2 = arith.constant 0 : index
    %1 = vector.load %arg2[%c0_1, %c0_2] : memref<32x128xbf16, #tpu.memory_space<vmem>>, vector<32x128xbf16>
    %cst = arith.constant dense<0.000000e+00> : vector<8x128xf32>
    %2 = tpu.matmul %0, %1, %cst {dimension_numbers = #tpu.dot_dimension_numbers<[1], [0], [0], [1], [0, 0, 1, 1], [], []>} : vector<8x32xbf16>, vector<32x128xbf16>, vector<8x128xf32> -> vector<8x128xf32>
    %c0_3 = arith.constant 0 : index
    %c0_4 = arith.constant 0 : index
    %3 = vector.load %arg3[%c0_3, %c0_4] : memref<1x128xf32, #tpu.memory_space<vmem>>, vector<1x128xf32>
    %4 = vector.broadcast %3 : vector<1x128xf32> to vector<8x128xf32>
    %5 = arith.addf %2, %4 : vector<8x128xf32>
    %cst_5 = arith.constant dense<0xFF800000> : vector<8xf32>
    %6 = vector.multi_reduction <maximumf>, %5, %cst_5 [1] : vector<8x128xf32> to vector<8xf32>
    %7 = vector.shape_cast %6 : vector<8xf32> to vector<8x1xf32>
    %8 = vector.broadcast %7 : vector<8x1xf32> to vector<8x128xf32>
    %9 = arith.subf %5, %8 : vector<8x128xf32>
    %10 = math.exp %9 : vector<8x128xf32>
    %cst_6 = arith.constant dense<0.000000e+00> : vector<8xf32>
    %11 = vector.multi_reduction <add>, %10, %cst_6 [1] : vector<8x128xf32> to vector<8xf32>
    %12 = vector.shape_cast %11 : vector<8xf32> to vector<8x1xf32>
    %13 = math.log %12 : vector<8x1xf32>
    %14 = vector.broadcast %13 : vector<8x1xf32> to vector<8x128xf32>
    %15 = arith.subf %9, %14 : vector<8x128xf32>
    %c0_7 = arith.constant 0 : index
    %c0_8 = arith.constant 0 : index
    %16 = vector.load %arg5[%c0_7, %c0_8] : memref<8x128xf32, #tpu.memory_space<vmem>>, vector<8x128xf32>
    tpu.vector_store %arg5[%c0_7, %c0_8], %15 {strides = array<i32>} : memref<8x128xf32, #tpu.memory_space<vmem>>, vector<8x128xf32>,
    %17 = tpu.iota {dimensions = array<i32: 1>} : vector<8x128xi32>
    %c0_9 = arith.constant 0 : index
    %c0_10 = arith.constant 0 : index
    %18 = vector.load %arg4[%c0_9, %c0_10] : memref<8x1xi32, #tpu.memory_space<vmem>>, vector<8x1xi32>
    %19 = vector.broadcast %18 : vector<8x1xi32> to vector<8x128xi32>
    %20 = arith.cmpi eq, %17, %19 : vector<8x128xi32>
    %cst_11 = arith.constant 0.000000e+00 : f32
    %21 = vector.broadcast %cst_11 : f32 to vector<8x128xf32>
    %22 = arith.select %20, %15, %21 : vector<8x128xi1>, vector<8x128xf32>
    %cst_12 = arith.constant dense<0.000000e+00> : vector<8xf32>
    %23 = vector.multi_reduction <add>, %22, %cst_12 [1] : vector<8x128xf32> to vector<8xf32>
    %24 = vector.shape_cast %23 : vector<8xf32> to vector<8x1xf32>
    %c8_i32 = arith.constant 8 : i32
    %25 = arith.muli %arg0, %c8_i32 : i32
    %26 = tpu.iota {dimensions = array<i32: 0>} : vector<8x1xi32>
    %27 = vector.broadcast %25 : i32 to vector<8x1xi32>
    %28 = arith.addi %27, %26 : vector<8x1xi32>
    %c8_i32_13 = arith.constant 8 : i32
    %29 = vector.broadcast %c8_i32_13 : i32 to vector<8x1xi32>
    %30 = arith.cmpi slt, %28, %29 : vector<8x1xi32>
    %cst_14 = arith.constant 0.000000e+00 : f32
    %31 = vector.broadcast %cst_14 : f32 to vector<8x1xf32>
    %32 = arith.select %30, %24, %31 : vector<8x1xi1>, vector<8x1xf32>
    %cst_15 = arith.constant dense<0.000000e+00> : vector<1xf32>
    %33 = vector.multi_reduction <add>, %32, %cst_15 [0] : vector<8x1xf32> to vector<1xf32>
    %34 = vector.shape_cast %33 : vector<1xf32> to vector<1x1xf32>
    %cst_16 = arith.constant 0.000000e+00 : f32
    %35 = vector.broadcast %cst_16 : f32 to vector<1x1xf32>
    %36 = arith.subf %35, %34 : vector<1x1xf32>
    %37 = vector.shape_cast %36 : vector<1x1xf32> to vector<1x1xf32>
    %38 = vector.broadcast %37 : vector<1x1xf32> to vector<1x128xf32>
    %c0_17 = arith.constant 0 : index
    %c0_18 = arith.constant 0 : index
    %39 = vector.load %arg6[%c0_17, %c0_18] : memref<1x128xf32, #tpu.memory_space<vmem>>, vector<1x128xf32>
    tpu.vector_store %arg6[%c0_17, %c0_18], %38 {strides = array<i32>} : memref<1x128xf32, #tpu.memory_space<vmem>>, vector<1x128xf32>,
    return
  }
  func.func @transform_0(%arg0: i32) -> (i32, i32) {
    %c0_i32 = arith.constant 0 : i32
    %c0_i32_0 = arith.constant 0 : i32
    return %arg0, %c0_i32 : i32, i32
  }
  func.func @transform_1(%arg0: i32) -> (i32, i32) {
    %c0_i32 = arith.constant 0 : i32
    %c0_i32_0 = arith.constant 0 : i32
    %c0_i32_1 = arith.constant 0 : i32
    return %c0_i32, %c0_i32_0 : i32, i32
  }
  func.func @transform_2(%arg0: i32) -> (i32, i32) {
    %c0_i32 = arith.constant 0 : i32
    %c0_i32_0 = arith.constant 0 : i32
    %c0_i32_1 = arith.constant 0 : i32
    return %c0_i32, %c0_i32_0 : i32, i32
  }
  func.func @transform_3(%arg0: i32) -> (i32, i32) {
    %c0_i32 = arith.constant 0 : i32
    %c0_i32_0 = arith.constant 0 : i32
    return %arg0, %c0_i32 : i32, i32
  }
  func.func @transform_4(%arg0: i32) -> (i32, i32) {
    %c0_i32 = arith.constant 0 : i32
    %c0_i32_0 = arith.constant 0 : i32
    return %arg0, %c0_i32 : i32, i32
  }
  func.func @transform_5(%arg0: i32) -> (i32, i32) {
    %c0_i32 = arith.constant 0 : i32
    %c0_i32_0 = arith.constant 0 : i32
    return %c0_i32, %arg0 : i32, i32
  }
}

</mosaic_0001>

<bundles_post_ra>
// kernel: fused_forward_nll.1
= control target key start
LH: loop header
LB: loop body
LE: loop exit
PB: predicated region body
PF: predicated region fallthrough
CT: control target
= control target key end

     0   :  { %v194_v1 = vmov 0.0   ;;  %vm195_vm0 = vmmov 0   ;;  %s258_s0 = inlined_call_operand.vmem [shape: bf16[8,32], index: 0, kind: input, shape index: {}]   ;;  %s259_s1 = inlined_call_operand.vmem [shape: bf16[32,128], index: 1, kind: input, shape index: {}]   ;;  %s260_s2 = inlined_call_operand.vmem [shape: f32[1,128], index: 2, kind: input, shape index: {}]   ;;  %s261_s3 = inlined_call_operand.vmem [shape: s32[8,1], index: 3, kind: input, shape index: {}]   ;;  %s262_s4 = inlined_call_operand.hbm [shape: f32[8,128], index: 4, kind: output, shape index: {0}]   ;;  %s263_s5 = inlined_call_operand.vmem [shape: f32[1,128], index: 5, kind: output, shape index: {1}]  }
   0x1   :  { %v164_v0 = vld [vmem:[%s259_s1] sm:$0xff]   ;;  %150 = vmatprep.subr.bf16.mxu0 %v194_v1  ;;  %v165_v2 = vld [vmem:[%s259_s1 + $0x8] sm:$0xff]   ;;  %154 = vmatprep.mubr.msk.bf16.mxu0 %vm195_vm0, %v194_v1 }
   0x2   :  { %151 = vmatpush3.bf16.msra.mxu0 %v164_v0 }
   0x3   :  { %152 = vmatprep.subr.bf16.mxu0 %v194_v1 }
   0x4   :  { %11 = vsyncpa [#allocation3], 0  ;;  %v21_v3 = vld [vmem:[%s258_s0] sm:$0xf]  ;;  %vm45_vm1 = vcmask 261120   ;;  %v196_v11 = vmov 0   ;;  %v100_v17 = vlaneseq }
   0x5   :  { %v143_v4 = vld [vmem:[%s260_s2] ss:$0 sm:$0xff]  ;;  %162 = vset.pattern.permute.xlu1 %v196_v11  ;;  %163 = vset.pattern.permute.xlu0 %v196_v11  ;;  %s197_s0 = smov [#allocation2]  }
   0x6   :  { %153 = vmatpush3.bf16.msra.mxu0 %v165_v2  ;;  %v102_v10 = vld [vmem:[%s261_s3] sm:$0xff]  ;;  %v101_v18 = vand.u32 127, %v100_v17  ;;  %s131_s2 = sshll.u32 %s197_s0, 4  ;;  %s132_s2 = int_to_ptr.vmem [resolvable:$true] %s131_s2 }
   0x7   :  { %104 = vperm.xlu1 %162, %v102_v10   ;;  %s170_s3 = scalar_lea.vmem %s132_s2, 128  ;;  %p175_p1 = scmp.lt.s32.totalorder %s132_s2, %s132_s2 }
   0x8   :  { %p171_p0 = scmp.ne.s32.totalorder %s132_s2, %s170_s3  ;;  %p176_p2 = scmp.lt.s32.totalorder %s170_s3, %s170_s3 }
   0x9   :  { %155 = vmatmul.mubr.msk.bf16.vlgmr.msra.gmra.mrb[0].mxu0 %vm45_vm1, %v21_v3 }
   0xa   :  { %p177_p3 = por %p176_p2, %p175_p1 }
   0xc   :  { %p178_p4 = pnand %p177_p3, %p171_p0 }
  0x86   :  { %v105_v19 = vpop.permute.xlu1 %104 }
  0x87   :  { %vm106_vm2 = vcmp.eq.s32.totalorder %v101_v18, %v105_v19 }
  0xdc   :  { %v83_v5 = vpop.f32.mrb[0].mxu0 }
  0xdd   :  { %v84_v6 = vadd.f32 %v143_v4, %v83_v5  ;;  %v156_v7 = vpop.f32.mrb[1].mxu0 }
  0xde   :  { %v86_v8 = vpop.f32.mrb[2].mxu0 }
  0xdf   :  { %89 = vmax.xlane.f32.xlu0 %v84_v6  ;;  %v157_v9 = vpop.f32.mrb[3].mxu0 }
 0x16c   :  { %v90_v12 = vpop.xlane.xlu0 %89 }
 0x16d   :  { %v91_v13 = vsub.f32 %v84_v6, %v90_v12 }
 0x16f   :  { %v92_v14 = vmul.f32 1.442695, %v91_v13 }
 0x171   :  { %166 = vpow2.f32 %v92_v14 }
 0x17b   :  { %v167_v15 = vpop.eup %166 }
 0x17c   :  { %94 = vadd.xlane.f32.xlu0 %v167_v15 }
 0x209   :  { %v95_v16 = vpop.xlane.xlu0 %94 }
 0x20a   :  { %168 = vlog2.f32 %v95_v16 }
 0x214   :  { %v169_v20 = vpop.eup %168 }
 0x215   :  { %v97_v21 = vmul.f32 0.6931472, %v169_v20 }
 0x217   :  { %v98_v22 = vsub.f32 %v91_v13, %v97_v21 }
 0x219   :  { %v107_v23 = vsel %vm106_vm2, %v98_v22, 0.0  ;;  %99 = vst [vmem:[#allocation2] sm:$0xff] %v98_v22 }
 0x21a   :  { %108 = vadd.xlane.f32.xlu1 %v107_v23 }
 0x21b   :  { %181 = shalt.err (!%p178_p4)
}
 0x21c   :  { %s182_s29 = scalar_lea.hbm %s262_s4, 128 }
 0x21d   :  { %p183_p5 = scmp.ne.s32.totalorder %s262_s4, %s182_s29  ;;  %p186_p6 = scmp.lt.u32.totalorder %s182_s29, %s262_s4 }
 0x21f   :  { %p188_p7 = pnand %p186_p6, %p183_p5 }
 0x221   :  { %191 = shalt.err (!%p188_p7)
}
 0x222   :  { %134 = dma.vmem_to_hbm [thread:$0]  %s132_s2, 128, %s262_s4, [#allocation3]  }
 0x2a7   :  { %v109_v24 = vpop.xlane.xlu1 %108 }
 0x2a8   :  { %v117_v25 = vrot.slane %v109_v24, 4 }
 0x2aa   :  { %v118_v26 = vadd.f32 %v117_v25, %v109_v24 }
 0x2ac   :  { %v119_v27 = vrot.slane %v118_v26, 2 }
 0x2ae   :  { %v120_v28 = vadd.f32 %v119_v27, %v118_v26 }
 0x2b0   :  { %v121_v29 = vrot.slane %v120_v28, 1 }
 0x2b2   :  { %v122_v30 = vadd.f32 %v121_v29, %v120_v28 }
 0x2b4   :  { %v123_v31 = vsub.f32 0.0, %v122_v30 }
 0x2b6   :  { %124 = vst [vmem:[%s263_s5] sm:$0x1] %v123_v31 }
 0x2b7   :  { %192 = dma.done.wait [#allocation3], 128  }
 0x2b8   :  { %193 = vsyncadd [#allocation3], 4294967168 }
 0x2b9   :  { %142 = vsyncpa [#allocation3], 1 }

</bundles_post_ra>
